<compile_context>
chip_gen: v7x
topology: tpu7x:2x2x1
jax: 0.10.0
libtpu: 0.0.40
codegen_flags: <defaults>
</compile_context>

<pallas_src>
import functools

import jax
import jax.numpy as jnp
from jax.experimental import pallas as pl
from jax.experimental.pallas import tpu as pltpu


def _round_up(x, m):
    return (x + m - 1) // m * m


def _pick_tile(dim, candidates):
    for t in candidates:
        if dim % t == 0:
            return t
    return dim


def _pool_embed_kernel(x_ref, w_ref, b_ref, y_ref, acc_ref, *, inv_hw):
    # Grid: (B // tB [parallel], C // tC [arbitrary/reduction])
    # x_ref:   (tB, HW, tC) input dtype (f32 or bf16), C on lanes
    # w_ref:   (tC, Ep)     f32 embed weight slice (pre-transposed from torch (E, C))
    # b_ref:   (1, Ep)      f32 embed bias (E padded to lane width)
    # y_ref:   (tB, Ep)     f32 pre-BN output  y = avgpool(x) @ W^T + b
    # acc_ref: (tB, Ep)     f32 VMEM accumulator, persists across the C axis
    c = pl.program_id(1)

    @pl.when(c == 0)
    def _():
        acc_ref[...] = jnp.zeros_like(acc_ref)

    # Partial spatial sum (sublane reduction) accumulated directly in f32 — no f32 copy
    # of the x tile is materialized.  1/HW scaling is deferred to the finalize step.
    pooled = jnp.sum(x_ref[...], axis=1, dtype=jnp.float32)          # (tB, tC)
    acc_ref[...] += jnp.dot(pooled, w_ref[...],
                            preferred_element_type=jnp.float32)      # (tB, Ep)

    @pl.when(c == pl.num_programs(1) - 1)
    def _():
        y_ref[...] = acc_ref[...] * inv_hw + b_ref[...]


def _batchnorm1d_kernel(y_ref, gamma_ref, beta_ref, o_ref):
    # BatchNorm1d, training mode: per-feature batch mean / biased variance, eps = 1e-5.
    y = y_ref[...]                                                   # (B, Ep) f32
    mean = jnp.mean(y, axis=0, keepdims=True)                        # (1, Ep)
    diff = y - mean
    var = jnp.mean(diff * diff, axis=0, keepdims=True)               # biased variance
    inv = jax.lax.rsqrt(var + 1e-5)
    o_ref[...] = (gamma_ref[...] * diff * inv + beta_ref[...]).astype(o_ref.dtype)


def encoder_cnn_forward(x_nchw, embed_w, embed_b, bn_gamma, bn_beta):
    """x_nchw: (B, C, H, W) backbone feature map; embed_w: torch-layout (E, C)."""
    B, C, H, W = x_nchw.shape
    HW = H * W
    E = embed_w.shape[0]
    Ep = max(_round_up(E, 128), 128)                 # lane-dense output width

    # ---- glue (layout only, no compute hoisting) ----
    # Put C on the lane axis: (B, C, H, W) -> (B, HW, C).
    x_bhwc = jnp.transpose(x_nchw.reshape(B, C, HW), (0, 2, 1))
    # Transpose weight to (C, E) and pad the E axis to lane width.
    w_pad = jnp.pad(embed_w.T.astype(jnp.float32), ((0, 0), (0, Ep - E)))
    b_pad = jnp.pad(embed_b.astype(jnp.float32), (0, Ep - E)).reshape(1, Ep)
    g_pad = jnp.pad(bn_gamma.astype(jnp.float32), (0, Ep - E),
                    constant_values=1.0).reshape(1, Ep)
    be_pad = jnp.pad(bn_beta.astype(jnp.float32), (0, Ep - E)).reshape(1, Ep)

    # ---- tile selection ----
    tC = _pick_tile(C, (512, 256, 128))              # lane-axis tile, multiple of 128 if possible
    tB = _pick_tile(B, (64, 32, 16, 8))              # falls back to full B for small batches

    # ---- VMEM budget from the chosen tiles (double-buffered inputs/outputs) ----
    x_tile_bytes = tB * HW * tC * x_bhwc.dtype.itemsize
    w_tile_bytes = tC * Ep * 4
    y_tile_bytes = tB * Ep * 4
    needed = 2 * (x_tile_bytes + w_tile_bytes + y_tile_bytes) + tB * Ep * 4 + 2 * Ep * 4
    vmem_limit = int(min(max(2 * needed, 16 << 20), 48 << 20))   # <= v7x 64 MiB physical

    # ---- pass 1: avgpool + Linear (pipelined over C, batch-parallel) ----
    y = pl.pallas_call(
        functools.partial(_pool_embed_kernel, inv_hw=1.0 / HW),
        out_shape=jax.ShapeDtypeStruct((B, Ep), jnp.float32),
        grid_spec=pltpu.PrefetchScalarGridSpec(
            num_scalar_prefetch=0,
            grid=(B // tB, C // tC),
            in_specs=[
                pl.BlockSpec((tB, HW, tC), lambda b, c: (b, 0, c)),
                pl.BlockSpec((tC, Ep), lambda b, c: (c, 0)),
                pl.BlockSpec((1, Ep), lambda b, c: (0, 0)),
            ],
            out_specs=pl.BlockSpec((tB, Ep), lambda b, c: (b, 0)),
            scratch_shapes=[pltpu.VMEM((tB, Ep), jnp.float32)],
        ),
        compiler_params=pltpu.CompilerParams(
            dimension_semantics=("parallel", "arbitrary"),
            vmem_limit_bytes=vmem_limit,
        ),
    )(x_bhwc, w_pad, b_pad)

    # ---- pass 2: BatchNorm1d over the whole (B, Ep) result (batch stats need full B) ----
    out_pad = pl.pallas_call(
        _batchnorm1d_kernel,
        out_shape=jax.ShapeDtypeStruct((B, Ep), jnp.float32),
        in_specs=[
            pl.BlockSpec((B, Ep), lambda: (0, 0)),
            pl.BlockSpec((1, Ep), lambda: (0, 0)),
            pl.BlockSpec((1, Ep), lambda: (0, 0)),
        ],
        out_specs=pl.BlockSpec((B, Ep), lambda: (0, 0)),
        compiler_params=pltpu.CompilerParams(vmem_limit_bytes=16 << 20),
    )(y, g_pad, be_pad)

    return out_pad[:, :E]


if __name__ == "__main__":
    # Small shapes consistent with the module's forward:
    #   B=2 images, C=384 backbone feature channels (stand-in for 2048, 3 C-tiles of 128),
    #   H=W=4 spatial (stand-in for 7x7), embed_size=16.
    B, C, H, W, E = 2, 384, 4, 4, 16

    key = jax.random.PRNGKey(0)
    k_x, k_w, k_b = jax.random.split(key, 3)

    x = jax.random.normal(k_x, (B, C, H, W), dtype=jnp.float32)

    # Deterministic synthetic parameters (no checkpoint load).
    embed_w = jax.random.normal(k_w, (E, C), dtype=jnp.float32) * 0.02   # torch Linear: (out, in)
    embed_b = jax.random.normal(k_b, (E,), dtype=jnp.float32) * 0.01
    bn_gamma = jnp.ones((E,), dtype=jnp.float32)     # BatchNorm1d default init
    bn_beta = jnp.zeros((E,), dtype=jnp.float32)

    out = encoder_cnn_forward(x, embed_w, embed_b, bn_gamma, bn_beta)
    out = jax.block_until_ready(out)
    assert out.shape == (B, E) and out.dtype == jnp.float32
    assert bool(jnp.isfinite(out).all())
    print("KERNEL_OK")
</pallas_src>

<mosaic_0001>
module attributes {stable_mosaic.version = 11 : i64} {
  func.func @_pool_embed_kernel(%arg0: i32, %arg1: i32, %arg2: memref<2x16x128xf32, #tpu.memory_space<vmem>>, %arg3: memref<128x128xf32, #tpu.memory_space<vmem>>, %arg4: memref<1x128xf32, #tpu.memory_space<vmem>>, %arg5: memref<2x128xf32, #tpu.memory_space<vmem>>, %arg6: memref<2x128xf32, #tpu.memory_space<vmem>>) attributes {dimension_semantics = [#tpu.dimension_semantics<parallel>, #tpu.dimension_semantics<arbitrary>], iteration_bounds = array<i64: 1, 3>, scalar_prefetch = 0 : i64, scratch_operands = 1 : i64, tpu.core_type = #tpu.core_type<tc>, window_params = [{transform_indices = @transform_0, window_bounds = array<i64: 2, 16, 128>}, {transform_indices = @transform_1, window_bounds = array<i64: 128, 128>}, {pipeline_mode = #tpu.pipeline_mode<synchronous>, transform_indices = @transform_2, window_bounds = array<i64: 1, 128>}, {transform_indices = @transform_3, window_bounds = array<i64: 2, 128>}]} {
    %c0_i32 = arith.constant 0 : i32
    %0 = arith.cmpi eq, %arg1, %c0_i32 : i32
    %1 = arith.extui %0 : i1 to i32
    %c0_i32_0 = arith.constant 0 : i32
    %2 = arith.cmpi ne, %1, %c0_i32_0 : i32
    scf.if %2 {
      %cst_11 = arith.constant 0.000000e+00 : f32
      %13 = vector.broadcast %cst_11 : f32 to vector<2x128xf32>
      %c0_12 = arith.constant 0 : index
      %c0_13 = arith.constant 0 : index
      %14 = vector.load %arg6[%c0_12, %c0_13] : memref<2x128xf32, #tpu.memory_space<vmem>>, vector<2x128xf32>
      tpu.vector_store %arg6[%c0_12, %c0_13], %13 {strides = array<i32>} : memref<2x128xf32, #tpu.memory_space<vmem>>, vector<2x128xf32>,
    } else {
    }
    %c0 = arith.constant 0 : index
    %c0_1 = arith.constant 0 : index
    %c0_2 = arith.constant 0 : index
    %3 = vector.load %arg2[%c0, %c0_1, %c0_2] : memref<2x16x128xf32, #tpu.memory_space<vmem>>, vector<2x16x128xf32>
    %cst = arith.constant dense<0.000000e+00> : vector<2x128xf32>
    %4 = vector.multi_reduction <add>, %3, %cst [1] : vector<2x16x128xf32> to vector<2x128xf32>
    %c0_3 = arith.constant 0 : index
    %c0_4 = arith.constant 0 : index
    %5 = vector.load %arg6[%c0_3, %c0_4] : memref<2x128xf32, #tpu.memory_space<vmem>>, vector<2x128xf32>
    %c0_5 = arith.constant 0 : index
    %c0_6 = arith.constant 0 : index
    %6 = vector.load %arg3[%c0_5, %c0_6] : memref<128x128xf32, #tpu.memory_space<vmem>>, vector<128x128xf32>
    %cst_7 = arith.constant dense<0.000000e+00> : vector<2x128xf32>
    %7 = tpu.matmul %4, %6, %cst_7 {dimension_numbers = #tpu.dot_dimension_numbers<[1], [0], [0], [1], [0, 0, 1, 1], [], []>} : vector<2x128xf32>, vector<128x128xf32>, vector<2x128xf32> -> vector<2x128xf32>
    %8 = arith.addf %5, %7 : vector<2x128xf32>
    %c0_8 = arith.constant 0 : index
    %c0_9 = arith.constant 0 : index
    %9 = vector.load %arg6[%c0_8, %c0_9] : memref<2x128xf32, #tpu.memory_space<vmem>>, vector<2x128xf32>
    tpu.vector_store %arg6[%c0_8, %c0_9], %8 {strides = array<i32>} : memref<2x128xf32, #tpu.memory_space<vmem>>, vector<2x128xf32>,
    %c2_i32 = arith.constant 2 : i32
    %10 = arith.cmpi eq, %arg1, %c2_i32 : i32
    %11 = arith.extui %10 : i1 to i32
    %c0_i32_10 = arith.constant 0 : i32
    %12 = arith.cmpi ne, %11, %c0_i32_10 : i32
    scf.if %12 {
      %c0_11 = arith.constant 0 : index
      %c0_12 = arith.constant 0 : index
      %13 = vector.load %arg6[%c0_11, %c0_12] : memref<2x128xf32, #tpu.memory_space<vmem>>, vector<2x128xf32>
      %cst_13 = arith.constant 6.250000e-02 : f32
      %14 = vector.broadcast %cst_13 : f32 to vector<2x128xf32>
      %15 = arith.mulf %13, %14 : vector<2x128xf32>
      %c0_14 = arith.constant 0 : index
      %c0_15 = arith.constant 0 : index
      %16 = vector.load %arg4[%c0_14, %c0_15] : memref<1x128xf32, #tpu.memory_space<vmem>>, vector<1x128xf32>
      %17 = vector.broadcast %16 : vector<1x128xf32> to vector<2x128xf32>
      %18 = arith.addf %15, %17 : vector<2x128xf32>
      %c0_16 = arith.constant 0 : index
      %c0_17 = arith.constant 0 : index
      %19 = vector.load %arg5[%c0_16, %c0_17] : memref<2x128xf32, #tpu.memory_space<vmem>>, vector<2x128xf32>
      tpu.vector_store %arg5[%c0_16, %c0_17], %18 {strides = array<i32>} : memref<2x128xf32, #tpu.memory_space<vmem>>, vector<2x128xf32>,
    } else {
    }
    return
  }
  func.func @transform_0(%arg0: i32, %arg1: i32) -> (i32, i32, i32) {
    %c0_i32 = arith.constant 0 : i32
    %c0_i32_0 = arith.constant 0 : i32
    return %arg0, %c0_i32, %arg1 : i32, i32, i32
  }
  func.func @transform_1(%arg0: i32, %arg1: i32) -> (i32, i32) {
    %c0_i32 = arith.constant 0 : i32
    %c0_i32_0 = arith.constant 0 : i32
    return %arg1, %c0_i32 : i32, i32
  }
  func.func @transform_2(%arg0: i32, %arg1: i32) -> (i32, i32) {
    %c0_i32 = arith.constant 0 : i32
    %c0_i32_0 = arith.constant 0 : i32
    %c0_i32_1 = arith.constant 0 : i32
    return %c0_i32, %c0_i32_0 : i32, i32
  }
  func.func @transform_3(%arg0: i32, %arg1: i32) -> (i32, i32) {
    %c0_i32 = arith.constant 0 : i32
    %c0_i32_0 = arith.constant 0 : i32
    return %arg0, %c0_i32 : i32, i32
  }
}

</mosaic_0001>

<bundles_post_ra>
// kernel: tpu_custom_call.1
= control target key start
LH: loop header
LB: loop body
LE: loop exit
PB: predicated region body
PF: predicated region fallthrough
CT: control target
= control target key end

     0   :  { %8 = vsyncpa [#allocation4], 0  ;;  %s1045_s0 = inlined_call_operand.hbm [shape: f32[2,16,384], index: 0, kind: input, shape index: {}]   ;;  %s1046_s1 = inlined_call_operand.hbm [shape: f32[384,128], index: 1, kind: input, shape index: {}]   ;;  %s1047_s2 = inlined_call_operand.vmem [shape: f32[1,128], index: 2, kind: input, shape index: {}]   ;;  %s1048_s3 = inlined_call_operand.hbm [shape: f32[2,128], index: 3, kind: output, shape index: {}]  }
   0x1   :  { %10 = vsyncpa [#allocation4 + $0x1], 0 }
   0x2   :  { %11 = vsyncpa [#allocation7], 0 }
   0x3   :  { %13 = vsyncpa [#allocation7 + $0x1], 0 }
   0x4   :  { %14 = vsyncpa [#allocation5], 0  ;;  %s812_s12 = smov 0   ;;  %s814_s13 = smov 0  }
   0x5   :  { %s816_s14 = smov 0   ;;  %s818_s15 = smov 0  }
   0x6   :  { %s820_s16 = smov 0   ;;  %s822_s17 = smov 0  }
   0x7 LB: > { %s467_s18 = sadd.s32 4294967295, %s780_s17   ;;  %s29_s19 = sadd.s32 1, %s776_s16  ;;  %s780_s17 = sphi %s822_s17, %s20_s17   ;;  %s776_s16 = sphi %s820_s16, %s1061_s16   ;;  %s772_s15 = sphi %s818_s15, %s1060_s15   ;;  %s768_s14 = sphi %s816_s14, %s1059_s14   ;;  %s764_s13 = sphi %s814_s13, %s1058_s13   ;;  %s760_s12 = sphi %s812_s12, %s1057_s12  }
   0x8   : > { %p30_p0 = scmp.ge.s32.totalorder %s29_s19, 3  ;;  %s41_s20 = sadd.s32 1, %s768_s14 }
   0x9   : > { %p48_p1 = scmp.ne.s32.totalorder %s768_s14, %s764_s13  ;;  %p49_p2 = scmp.eq.s32.totalorder %s780_s17, 0 }
   0xa   : > { %s1063_s19 = smov (%p30_p0, %s29_s19), 0  ;;  %p54_p4 = scmp.ne.s32.totalorder %s764_s13, %s760_s12 }
   0xb   : > { %p848_p3 = por %p49_p2, %p48_p1  ;;  %s37_s22 = ssub.s32 %s776_s16, %s1063_s19 }
   0xc   : > { %p55_p5 = scmp.eq.s32.totalorder %s467_s18, 0  ;;  %p39_p6 = scmp.eq.s32.totalorder %s37_s22, 0 }
   0xd   : > { %p577_p8 = scmp.lt.s32.totalorder %s780_s17, 3  ;;  %s866_s25 = sand.u32 1, %s768_s14  }
   0xe   : > { %p857_p7 = por %p55_p5, %p54_p4  ;;  %s471_s26 = sshll.u32 %s776_s16, 7 }
   0xf   : > { %s863_s24 = scalar_select %p39_p6, %s768_s14, %s41_s20  }
  0x10   : > { %s1051_s23 = scalar_select %p857_p7, 1, 0 }
  0x11   : > { %s470_s27 = sshll.u32 %s866_s25, 5  ;;  %s873_s30 = scalar_lea.hbm %s1045_s0, %s471_s26 }
  0x12   : > { %s158_s4 = scalar_lea.vmem [#allocation3], %s470_s27  ;;  %p877_p9 = pnand %p577_p8, %p848_p3 }
  0x13   : > { %s167_s5 = sshll.u32 %s158_s4, 4  ;;  %s155_s7 = scalar_lea.sflag [#allocation4], %s866_s25  ;;  %s881_s5 = int_to_ptr.vmem [resolvable:$true] %s167_s5 }
  0x14   : > { %s636_s8 = scalar_lea.hbm %s873_s30, 512  ;;  %p638_p12 = pneg %p877_p9 }
  0x15   : > { %p637_p11 = scmp.ne.s32.totalorder %s873_s30, %s636_s8  ;;  %s641_s11 = scalar_lea.hbm %s1045_s0, 1536 }
  0x16   : > { %p642_p1 = scmp.lt.u32.totalorder %s873_s30, %s1045_s0  ;;  %p643_p2 = scmp.lt.u32.totalorder %s641_s11, %s636_s8 }
  0x17   : > { %p639_p13 = pnand %p638_p12, %p637_p11  ;;  %p645_p4 = scmp.lt.u32.totalorder %s636_s8, %s873_s30 }
  0x18   : > { %p644_p3 = por %p643_p2, %p642_p1 }
  0x19   : > { %p640_p0 = pneg %p639_p13 }
  0x1a   : > { %p646_p5 = por %p645_p4, %p644_p3 }
  0x1c   : > { %p647_p6 = pnand %p646_p5, %p640_p0 }
  0x1e   : > { %650 = shalt.err (!%p647_p6)
}
  0x1f   : > { %s651_s21 = scalar_lea.vmem %s881_s5, 512  ;;  %s782_s22 = smov [#allocation3]  }
  0x20   : > { %p652_p8 = scmp.ne.s32.totalorder %s881_s5, %s651_s21  ;;  %s656_s26 = sshll.u32 %s782_s22, 4  ;;  %s657_s26 = int_to_ptr.vmem [resolvable:$false] %s656_s26 }
  0x21   : > { %s658_s27 = scalar_lea.vmem %s657_s26, 1024  ;;  %p659_p10 = scmp.lt.s32.totalorder %s881_s5, %s657_s26 }
  0x22   : > { %p654_p11 = pnand %p652_p8, %p638_p12  ;;  %p660_p1 = scmp.lt.s32.totalorder %s658_s27, %s651_s21 }
  0x24   : > { %p655_p13 = pneg %p654_p11  ;;  %p661_p2 = por %p660_p1, %p659_p10 }
  0x26   : > { %p662_p3 = pnand %p661_p2, %p655_p13 }
  0x28   : > { %665 = shalt.err (!%p662_p3)
}
  0x29   : > { %s783_s28 = smov 384   ;;  %s784_s29 = smov 128  }
  0x2a   : > { %s785_s4 = smov 8   ;;  %p196_p10 = scmp.lt.s32.totalorder %s780_s17, 4 }
  0x2b   : > { %573 = dma.hbm_to_vmem [thread:$0]  (!%p877_p9), %s873_s30, 512, %s881_s5, %s155_s7, %s783_s28, %s784_s29, %s785_s4  }
  0x2c   : > { %s472_s8 = sshll.u32 %s866_s25, 7  ;;  %s485_s9 = sshll.u32 %s776_s16, 11 }
  0x2d   : > { %p1053_p0 = scmp.ge.s32.totalorder %s780_s17, 1  ;;  %s926_s20 = scalar_lea.hbm %s1046_s1, %s485_s9 }
  0x2e   : > { %s181_s21 = scalar_lea.vmem [#allocation6], %s472_s8  ;;  %s178_s30 = scalar_lea.sflag [#allocation7], %s866_s25 }
  0x2f   : > { %p919_p4 = pnand %p1053_p0, %p196_p10  ;;  %s188_s22 = sshll.u32 %s181_s21, 4  ;;  %s928_s22 = int_to_ptr.vmem [resolvable:$true] %s188_s22 }
  0x30   : > { %s666_s5 = scalar_lea.hbm %s926_s20, 2048  ;;  %s671_s27 = scalar_lea.hbm %s1046_s1, 6144 }
  0x31   : > { %p667_p5 = scmp.ne.s32.totalorder %s926_s20, %s666_s5  ;;  %p672_p11 = scmp.lt.u32.totalorder %s926_s20, %s1046_s1 }
  0x32   : > { %p673_p13 = scmp.lt.u32.totalorder %s671_s27, %s666_s5  ;;  %p675_p2 = scmp.lt.u32.totalorder %s666_s5, %s926_s20 }
  0x33   : > { %p669_p6 = pnand %p667_p5, %p638_p12 }
  0x34   : > { %p674_p1 = por %p673_p13, %p672_p11 }
  0x35   : > { %p670_p8 = pneg %p669_p6 }
  0x36   : > { %p676_p3 = por %p675_p2, %p674_p1 }
  0x38   : > { %p677_p10 = pnand %p676_p3, %p670_p8 }
  0x3a   : > { %680 = shalt.err (!%p677_p10)
}
  0x3b   : > { %s681_s8 = scalar_lea.vmem %s928_s22, 2048  ;;  %s786_s11 = smov [#allocation6]  }
  0x3c   : > { %p682_p0 = scmp.ne.s32.totalorder %s928_s22, %s681_s8  ;;  %s686_s12 = sshll.u32 %s786_s11, 4  ;;  %s687_s12 = int_to_ptr.vmem [resolvable:$false] %s686_s12 }
  0x3d   : > { %s688_s21 = scalar_lea.vmem %s687_s12, 4096  ;;  %p689_p7 = scmp.lt.s32.totalorder %s928_s22, %s687_s12 }
  0x3e   : > { %p684_p5 = pnand %p682_p0, %p638_p12  ;;  %p690_p11 = scmp.lt.s32.totalorder %s688_s21, %s681_s8 }
  0x40   : > { %p685_p6 = pneg %p684_p5  ;;  %p691_p13 = por %p690_p11, %p689_p7 }
  0x42   : > { %p692_p1 = pnand %p691_p13, %p685_p6 }
  0x44   : > { %695 = shalt.err (!%p692_p1)
}
  0x45   : > { %576 = dma.hbm_to_vmem [thread:$0]  (!%p877_p9), %s926_s20, 2048, %s928_s22, %s178_s30, %s784_s29, %s784_s29, %s785_s4  }
  0x46   : > { %200 = sbr.rel (%p919_p4) target bundleno = 376 (0x178), region = 32  ;;  %s202_s5 = sand.u32 (!%p919_p4), 1, %s764_s13  }
  0x47   : > { %s476_s7 = sshll.u32 (!%p919_p4), %s202_s5, 5  ;;  %s203_s26 = scalar_lea.sflag (!%p919_p4), [#allocation4], %s202_s5 }
  0x48   : > { %s962_s27 = scalar_lea.vmem (!%p919_p4), [#allocation3], %s476_s7  ;;  %p1055_p7 = scmp.ne.s32.totalorder (!%p919_p4), %s1051_s23, 0 }
  0x4d   : > { %747 = dma.done.wait (%p1055_p7), %s203_s26, 512  }
  0x4e   : > { %749 = vsyncadd (%p1055_p7), %s203_s26, 4294966784  ;;  %s477_s25 = sshll.u32 %s202_s5, 7  ;;  %s212_s6 = scalar_lea.sflag [#allocation7], %s202_s5 }
  0x4f   : > { %s968_s28 = scalar_lea.vmem [#allocation6], %s477_s25 }
  0x50   : > { %751 = dma.done.wait (%p1055_p7), %s212_s6, 2048  }
  0x51   : > { %753 = vsyncadd (%p1055_p7), %s212_s6, 4294965248  ;;  %p478_p9 = scmp.ne.s32.totalorder %s772_s15, 0 }
  0x52   : > { %v787_v0 = vmov (!%p478_p9), 0.0  }
  0x53   : > { %243 = sbr.rel (%p478_p9) target bundleno = 90 (0x5a), region = 44  ;;  %244 = vst [vmem:[#allocation2] sm:$0x3] (!%p478_p9), %v787_v0 }
  0x5a PF: > { %v264_v1 = vld [vmem:[%s968_s28] sm:$0xff]  ;;  %v265_v2 = vld [vmem:[%s968_s28 + $0x8] sm:$0xff]  ;;  %v266_v3 = vld [vmem:[%s968_s28 + $0x10] sm:$0xff]  ;;  %v788_v4 = vmov 0.0|0.0   ;;  %vm789_vm0 = vmmov 0   ;;  %v790_v7 = vmov 0.0  }
  0x5b   : > { %538 = vmatprep.subr.bf16.mxu0 %v788_v4  ;;  %v539_v5 = vpack.c.bf16 %v265_v2, %v264_v1  ;;  %v267_v6 = vld [vmem:[%s968_s28 + $0x18] sm:$0xff]  ;;  %535 = vmatprep.mubr.msk.f32.mxu0 %vm789_vm0, %v790_v7  ;;  %v268_v9 = vld [vmem:[%s968_s28 + $0x20] sm:$0xff]  ;;  %v269_v10 = vld [vmem:[%s968_s28 + $0x28] sm:$0xff]  ;;  %vm282_vm1 = vcmask 1041409   ;;  %p479_p12 = scmp.ne.s32.totalorder %s772_s15, 2 }
  0x5c   : > { %v542_v8 = vpack.c.bf16 %v267_v6, %v266_v3  ;;  %v245_v11 = vld [vmem:[%s962_s27] sm:$0xff]  ;;  %v246_v12 = vld [vmem:[%s962_s27 + $0x8] sm:$0xff]  ;;  %v247_v13 = vld [vmem:[%s962_s27 + $0x10] sm:$0xff]  ;;  %v545_v16 = vpack.c.bf16 %v269_v10, %v268_v9 }
  0x5d   : > { %540 = vmatpush3.bf16.msra.mxu0 %v539_v5  ;;  %v248_v14 = vld [vmem:[%s962_s27 + $0x18] sm:$0xff]  ;;  %v249_v15 = vadd.f32 %v246_v12, %v245_v11  ;;  %v270_v18 = vld [vmem:[%s968_s28 + $0x30] sm:$0xff]  ;;  %v272_v25 = vld [vmem:[%s968_s28 + $0x40] sm:$0xff] }
  0x5e   : > { %541 = vmatprep.subr.bf16.mxu0 %v788_v4  ;;  %v256_v17 = vadd.f32 %v248_v14, %v247_v13  ;;  %v271_v19 = vld [vmem:[%s968_s28 + $0x38] sm:$0xff]  ;;  %v273_v26 = vld [vmem:[%s968_s28 + $0x48] sm:$0xff]  ;;  %v274_v30 = vld [vmem:[%s968_s28 + $0x50] sm:$0xff] }
  0x5f   : > { %v250_v20 = vrot.slane %v249_v15, 4  ;;  %v548_v22 = vpack.c.bf16 %v271_v19, %v270_v18  ;;  %v551_v27 = vpack.c.bf16 %v273_v26, %v272_v25  ;;  %v275_v31 = vld [vmem:[%s968_s28 + $0x58] sm:$0xff]  ;;  %v276_v35 = vld [vmem:[%s968_s28 + $0x60] sm:$0xff]  ;;  %v277_v36 = vld [vmem:[%s968_s28 + $0x68] sm:$0xff] }
  0x60   : > { %v257_v21 = vrot.slane %v256_v17, 4  ;;  %v554_v32 = vpack.c.bf16 %v275_v31, %v274_v30  ;;  %v557_v37 = vpack.c.bf16 %v277_v36, %v276_v35  ;;  %v278_v40 = vld [vmem:[%s968_s28 + $0x70] sm:$0xff]  ;;  %v279_v41 = vld [vmem:[%s968_s28 + $0x78] sm:$0xff] }
  0x61   : > { %543 = vmatpush3.bf16.msra.mxu0 %v542_v8  ;;  %v251_v23 = vadd.f32 %v250_v20, %v249_v15  ;;  %v560_v42 = vpack.c.bf16 %v279_v41, %v278_v40  ;;  %v263_v46 = vld [vmem:[#allocation2] sm:$0x3] }
  0x62   : > { %544 = vmatprep.subr.bf16.mxu0 %v788_v4  ;;  %v258_v24 = vadd.f32 %v257_v21, %v256_v17  ;;  %v480_v51 = vld [vmem:[%s1047_s2] ss:$0 sm:$0xff] (!%p479_p12) }
  0x63   : > { %v252_v28 = vrot.slane %v251_v23, 2 }
  0x64   : > { %v259_v29 = vrot.slane %v258_v24, 2 }
  0x65   : > { %546 = vmatpush3.bf16.msra.mxu0 %v545_v16  ;;  %v253_v33 = vadd.f32 %v252_v28, %v251_v23 }
  0x66   : > { %547 = vmatprep.subr.bf16.mxu0 %v788_v4  ;;  %v260_v34 = vadd.f32 %v259_v29, %v258_v24 }
  0x67   : > { %v254_v38 = vrot.slane %v253_v33, 1 }
  0x68   : > { %v261_v39 = vrot.slane %v260_v34, 1 }
  0x69   : > { %549 = vmatpush3.bf16.msra.mxu0 %v548_v22  ;;  %v255_v43 = vadd.f32 %v254_v38, %v253_v33 }
  0x6a   : > { %550 = vmatprep.subr.bf16.mxu0 %v788_v4  ;;  %v262_v44 = vadd.f32 %v261_v39, %v260_v34 }
  0x6c   : > { %v283_v45 = vsel %vm282_vm1, %v262_v44, %v255_v43 }
  0x6d   : > { %552 = vmatpush3.bf16.msra.mxu0 %v551_v27 }
  0x6e   : > { %553 = vmatprep.subr.bf16.mxu0 %v788_v4 }
  0x71   : > { %555 = vmatpush3.bf16.msra.mxu0 %v554_v32 }
  0x72   : > { %556 = vmatprep.subr.bf16.mxu0 %v788_v4 }
  0x75   : > { %558 = vmatpush3.bf16.msra.mxu0 %v557_v37 }
  0x76   : > { %559 = vmatprep.subr.bf16.mxu0 %v788_v4 }
  0x79   : > { %561 = vmatpush3.bf16.msra.mxu0 %v560_v42 }
  0x7c   : > { %536 = vmatmul.mubr.f32.vlgmr.msra.gmra.mrb[0].mxu0 %v283_v45 }
 0x14c   : > { %360 = sbr.rel (%p479_p12) target bundleno = 351 (0x15f), region = 48 }
 0x14f   : > { %v351_v47 = vpop.f32.mrb[0].mxu0 }
 0x150   : > { %v355_v48 = vadd.f32 %v351_v47, %v263_v46  ;;  %v537_v49 = vpop.f32.mrb[1].mxu0 }
 0x152   : > { %356 = vst [vmem:[#allocation2] sm:$0x3] %v355_v48 }
 0x159   : > { %v361_v50 = vld [vmem:[#allocation2] sm:$0x3] }
 0x15a   : > { %v362_v52 = vmul.f32 0.0625, %v361_v50 }
 0x15c   : > { %v370_v53 = vadd.f32 %v480_v51, %v362_v52 }
 0x15e   : > { %371 = vst [vmem:[#allocation8] sm:$0x3] %v370_v53 }
 0x15f PF: > { %p1001_p4 = scmp.eq.s32.totalorder %s467_s18, 2  ;;  %s791_s10 = smov [#allocation8]  }
 0x160   : > { %s381_s20 = sshll.u32 %s791_s10, 4  ;;  %s382_s20 = int_to_ptr.vmem [resolvable:$true] %s381_s20 }
 0x161   : > { %s696_s15 = scalar_lea.vmem %s382_s20, 32  ;;  %p703_p10 = scmp.lt.s32.totalorder %s382_s20, %s382_s20 }
 0x162   : > { %p697_p8 = scmp.ne.s32.totalorder %s382_s20, %s696_s15  ;;  %p704_p0 = scmp.lt.s32.totalorder %s696_s15, %s696_s15 }
 0x164   : > { %p698_p2 = pnand %p697_p8, %p1001_p4  ;;  %p705_p5 = por %p704_p0, %p703_p10 }
 0x166   : > { %p699_p3 = pneg %p698_p2 }
 0x168   : > { %p706_p6 = pnand %p705_p5, %p699_p3 }
 0x16a   : > { %709 = shalt.err (!%p706_p6)
}
 0x16b   : > { %s710_s18 = scalar_lea.hbm %s1048_s3, 32 }
 0x16c   : > { %p711_p11 = scmp.ne.s32.totalorder %s1048_s3, %s710_s18  ;;  %p716_p7 = scmp.lt.u32.totalorder %s710_s18, %s1048_s3 }
 0x16e   : > { %p712_p13 = pnand %p711_p11, %p1001_p4 }
 0x170   : > { %p713_p1 = pneg %p712_p13 }
 0x172   : > { %p718_p9 = pnand %p716_p7, %p713_p1 }
 0x174   : > { %721 = shalt.err (!%p718_p9)
}
 0x175   : > { %567 = dma.vmem_to_hbm [thread:$0]  (%p1001_p4), %s382_s20, 32, %s1048_s3, [#allocation5]  }
 0x176   : > { %755 = dma.done.wait (%p1001_p4), [#allocation5], 32  }
 0x177   : > { %757 = vsyncadd (%p1001_p4), [#allocation5], 4294967264 }
 0x178 PF: > { %s20_s17 = sadd.s32 1, %s780_s17   ;;  %s1057_s12 = smov %s764_s13 }
 0x179   : > { %p17_p12 = scmp.ge.s32.totalorder %s20_s17, 5   ;;  %s1058_s13 = smov %s768_s14 }
 0x17a   : > { %s1059_s14 = smov %s863_s24  ;;  %s1060_s15 = smov %s776_s16 }
 0x17b   : > { %s1061_s16 = smov %s1063_s19  ;;  %19 = sbr.rel (!%p17_p12) target bundleno = 7 (0x7), region = 91 }
 0x182   :  { %394 = vsyncpa [#allocation4], 1 }
 0x183   :  { %396 = vsyncpa [#allocation4 + $0x1], 1 }
 0x184   :  { %397 = vsyncpa [#allocation7], 1 }
 0x185   :  { %399 = vsyncpa [#allocation7 + $0x1], 1 }
 0x186   :  { %400 = vsyncpa [#allocation5], 1 }
 0x187   :  { %402 = vsyncpa [#allocation5 + $0x1], 1 }

</bundles_post_ra>
